<compile_context>
chip_gen: v5e
topology: v5e:2x2
jax: 0.10.0
libtpu: 0.0.40
codegen_flags: <defaults>
</compile_context>

<pallas_src>
import functools

import jax
import jax.numpy as jnp
from jax.experimental import pallas as pl
from jax.experimental.pallas import tpu as pltpu

_LANE = 128
_SUBLANE = 8


def _round_up(n, m):
    return (n + m - 1) // m * m


def _pad2d(a, rows, cols):
    return jnp.pad(a, ((0, rows - a.shape[0]), (0, cols - a.shape[1])))


def _choose_b_blk(batch_size, num_stocks, cin_p, hid_p, cls_p):
    """Batches per grid step.

    Goals: multiple of 8 (sublane-aligned per-batch output block) dividing
    batch_size; first-layer LHS (b_blk*num_stocks rows) near ~512 rows for MXU
    occupancy on v6e/v7x (v5e saturates earlier); >= 2 grid steps when possible
    (two v7x TensorCores); pipelined blocks well under the v7x VMEM budget.
    """
    cands = [d for d in range(_SUBLANE, batch_size // 2 + 1, _SUBLANE)
             if batch_size % d == 0]
    if not cands:
        return batch_size                  # tiny problem: one step over everything

    vmem_blk_budget = 24 * 1024 * 1024     # conservative: fits v7x with headroom

    def blk_bytes(d):
        x_blk = 2 * d * num_stocks * cin_p * 2      # bf16 x block, double-buffered
        m_blk = d * num_stocks * hid_p * 4          # fp32 in_layer activation
        o_blk = 2 * d * cls_p * 4                   # fp32 out block, double-buffered
        return x_blk + m_blk + o_blk

    cands = [d for d in cands if blk_bytes(d) <= vmem_blk_budget] or cands[:1]
    target = max(_SUBLANE, 512 // max(num_stocks, 1))
    under = [d for d in cands if d <= target]
    return max(under) if under else min(cands)


# ---------------------------------------------------------------------------
# Pallas kernel: one grid step = B_BLK batches.  Weights VMEM-resident.
# ---------------------------------------------------------------------------
def _our_model_kernel(
    x_ref,                                   # (b_blk*num_stocks, Cin_p)
    # GCNN layer 1 params
    w1a_ref, b1a_ref, w2a_ref, b2a_ref, w3a_ref, b3a_ref,
    # GCNN layer 2 params
    w1b_ref, b1b_ref, w2b_ref, b2b_ref, w3b_ref, b3b_ref,
    # output head params
    wo_ref, bo_ref,
    out_ref,                                 # (b_blk, Ncls_p) f32  (one row/batch)
    *, num_stocks, num_news, b_blk,
):
    def linear_relu(h, w_ref, b_ref):
        acc = jnp.dot(h.astype(jnp.bfloat16), w_ref[...],
                      preferred_element_type=jnp.float32)   # MXU, fp32 accumulate
        return jnp.maximum(acc + b_ref[...], 0.0)            # fp32 VPU

    hid_p = w1a_ref.shape[1]

    # ---- GCNN layer 1 -------------------------------------------------------
    # in_layer is the only matmul that needs per-stock rows.
    m = linear_relu(x_ref[...], w1a_ref, b1a_ref)             # (b_blk*S, H) f32

    # stock -> news propagation (SimpleConv aggr='add' on the per-batch
    # complete-bipartite graph): every news row of a batch receives the same
    # per-batch sum, so keep exactly ONE row per batch from here on.
    s = jnp.sum(m.reshape(b_blk, num_stocks, hid_p), axis=1)  # (b_blk, H)  XLU

    c = linear_relu(s, w2a_ref, b2a_ref)                       # mid_layer (b_blk, H)
    # news -> stock propagation: sum of num_news identical rows == scalar scale.
    h1 = linear_relu(float(num_news) * c, w3a_ref, b3a_ref)    # out_layer (b_blk, C)

    # ---- GCNN layer 2 (all stock rows of a batch are identical now) ---------
    m2 = linear_relu(h1, w1b_ref, b1b_ref)                      # (b_blk, H)
    c2 = linear_relu(float(num_stocks) * m2, w2b_ref, b2b_ref)  # (b_blk, H)
    h2 = linear_relu(float(num_news) * c2, w3b_ref, b3b_ref)    # (b_blk, C)

    # ---- output head + sigmoid: one lane-dense row per batch ----------------
    logits = jnp.dot(h2.astype(jnp.bfloat16), wo_ref[...],
                     preferred_element_type=jnp.float32) + bo_ref[...]
    out_ref[...] = jax.nn.sigmoid(logits)                       # (b_blk, Ncls_p)


# ---------------------------------------------------------------------------
# Wrapper: pads feature dims to 128 lanes, casts matmul operands to bf16,
# blocks the batch grid, broadcasts the per-batch rows back to per-stock rows.
# ---------------------------------------------------------------------------
@functools.partial(jax.jit, static_argnames=("num_stocks", "num_news", "n_class"))
def our_model_pallas(x, params, *, num_stocks, num_news, n_class):
    (w1a, b1a, w2a, b2a, w3a, b3a,
     w1b, b1b, w2b, b2b, w3b, b3b, wo, bo) = params

    stocks_len, in_ch = x.shape
    # BlockSpecs + the in-kernel per-batch reduction rely on sublane-aligned
    # row counts and an integer number of batches: fail loudly otherwise.
    assert num_stocks % _SUBLANE == 0, "num_stocks must be a multiple of 8"
    assert num_news % _SUBLANE == 0, "num_news must be a multiple of 8"
    assert stocks_len % num_stocks == 0, "stocks_len must divide into batches"
    batch_size = stocks_len // num_stocks

    hid = w1a.shape[1]
    out_ch = w3a.shape[1]

    cin_p = _round_up(in_ch, _LANE)
    hid_p = _round_up(hid, _LANE)
    out_p = _round_up(out_ch, _LANE)
    cls_p = _round_up(n_class, _LANE)

    def wpad(a, r, c):                       # lane-dense bf16 matmul operand
        return _pad2d(a, r, c).astype(jnp.bfloat16)

    def bpad(a, c):                          # biases stay fp32
        return _pad2d(a, 1, c).astype(jnp.float32)

    # Skip the extra wrapper HBM round trip over x when its lane dim is already
    # aligned; the kernel casts to bf16 on the fly in that case.
    if in_ch == cin_p:
        x_p = x
    else:
        x_p = _pad2d(x, stocks_len, cin_p).astype(jnp.bfloat16)

    operands = (
        x_p,
        wpad(w1a, cin_p, hid_p), bpad(b1a, hid_p),
        wpad(w2a, hid_p, hid_p), bpad(b2a, hid_p),
        wpad(w3a, hid_p, out_p), bpad(b3a, out_p),
        wpad(w1b, out_p, hid_p), bpad(b1b, hid_p),
        wpad(w2b, hid_p, hid_p), bpad(b2b, hid_p),
        wpad(w3b, hid_p, out_p), bpad(b3b, out_p),
        wpad(wo, out_p, cls_p), bpad(bo, cls_p),
    )

    b_blk = _choose_b_blk(batch_size, num_stocks, cin_p, hid_p, cls_p)

    def resident(a):                         # constant-index, stays in VMEM
        return pl.BlockSpec(a.shape, lambda i: (0, 0))

    in_specs = [pl.BlockSpec((b_blk * num_stocks, cin_p), lambda i: (i, 0))]
    in_specs += [resident(a) for a in operands[1:]]

    # VMEM budget: resident weights (2 pipeline buffers each) + pipelined
    # x/out blocks + fp32 intermediates; capped at 48 MiB so the same choice
    # fits v7x's 64 MiB as well as v5e/v6e's 128 MiB.
    weight_bytes = sum(int(a.size) * a.dtype.itemsize for a in operands[1:])
    x_blk_bytes = (int(operands[0].size) // batch_size) * b_blk \
        * operands[0].dtype.itemsize
    blk_bytes = 2 * x_blk_bytes + 2 * b_blk * cls_p * 4 \
        + b_blk * num_stocks * hid_p * 4
    vmem_limit = int(min(48 * 1024 * 1024,
                         max(32 * 1024 * 1024,
                             2 * weight_bytes + blk_bytes + (4 << 20))))

    out_batch = pl.pallas_call(
        functools.partial(_our_model_kernel,
                          num_stocks=num_stocks, num_news=num_news, b_blk=b_blk),
        out_shape=jax.ShapeDtypeStruct((batch_size, cls_p), jnp.float32),
        grid=(batch_size // b_blk,),
        in_specs=in_specs,
        out_specs=pl.BlockSpec((b_blk, cls_p), lambda i: (i, 0)),
        compiler_params=pltpu.CompilerParams(
            dimension_semantics=("parallel",),
            vmem_limit_bytes=vmem_limit,
        ),
    )(*operands)

    # All stocks of a batch share the same output row (per-batch complete-
    # bipartite graph + 'add' aggregation), so the kernel emits one row per
    # batch and the cheap broadcast back to per-stock rows happens here.
    out = jnp.broadcast_to(out_batch[:, None, :n_class],
                           (batch_size, num_stocks, n_class))
    return out.reshape(stocks_len, n_class)


# ---------------------------------------------------------------------------
# Deterministic parameter init (PyTorch nn.Linear-style uniform(+-1/sqrt(fan_in)))
# ---------------------------------------------------------------------------
def _linear_params(key, fan_in, fan_out):
    kw, kb = jax.random.split(key)
    bound = 1.0 / (fan_in ** 0.5)
    w = jax.random.uniform(kw, (fan_in, fan_out), jnp.float32, -bound, bound)
    b = jax.random.uniform(kb, (1, fan_out), jnp.float32, -bound, bound)
    return w, b


def make_params(key, in_channel, hidden_channel, out_channel, n_class):
    keys = jax.random.split(key, 7)
    # GCNN layer 1 (ignore_in_channel=False -> in_channel)
    w1a, b1a = _linear_params(keys[0], in_channel, hidden_channel)
    w2a, b2a = _linear_params(keys[1], hidden_channel, hidden_channel)
    w3a, b3a = _linear_params(keys[2], hidden_channel, out_channel)
    # GCNN layer 2 (ignore_in_channel=True -> out_channel)
    w1b, b1b = _linear_params(keys[3], out_channel, hidden_channel)
    w2b, b2b = _linear_params(keys[4], hidden_channel, hidden_channel)
    w3b, b3b = _linear_params(keys[5], hidden_channel, out_channel)
    # output head
    wo, bo = _linear_params(keys[6], out_channel, n_class)
    return (w1a, b1a, w2a, b2a, w3a, b3a,
            w1b, b1b, w2b, b2b, w3b, b3b,
            wo, bo)


# ---------------------------------------------------------------------------
# Plain-JAX reference (scatter-add message passing over edge_index), matching
# the kernel's precision policy (bf16 matmul operands, fp32 accumulation).
# ---------------------------------------------------------------------------
def _aggregate(x_src, src_idx, dst_idx, num_dst):
    # SimpleConv(aggr='add'): out[dst] = sum over edges of x_src[src]
    return jnp.zeros((num_dst, x_src.shape[1]), jnp.float32).at[dst_idx].add(
        x_src[src_idx])


def our_model_reference(x, edge_index, params, num_news_total, n_class):
    (w1a, b1a, w2a, b2a, w3a, b3a,
     w1b, b1b, w2b, b2b, w3b, b3b, wo, bo) = params
    stocks_len = x.shape[0]
    news_src, stock_dst = edge_index[0], edge_index[1]

    def mm(h, w):
        return jnp.dot(h.astype(jnp.bfloat16), w.astype(jnp.bfloat16),
                       preferred_element_type=jnp.float32)

    def linear_relu(h, w, b):
        return jnp.maximum(mm(h, w) + b, 0.0)

    def gcnn(h, w1, b1, w2, b2, w3, b3):
        m = linear_relu(h, w1, b1)
        # back_edge: stock -> news
        c = _aggregate(m, stock_dst, news_src, num_news_total)
        c = linear_relu(c, w2, b2)
        # edge_index: news -> stock
        m2 = _aggregate(c, news_src, stock_dst, stocks_len)
        return linear_relu(m2, w3, b3)

    h = gcnn(x, w1a, b1a, w2a, b2a, w3a, b3a)
    h = gcnn(h, w1b, b1b, w2b, b2b, w3b, b3b)
    return jax.nn.sigmoid(mm(h, wo) + bo)


if __name__ == "__main__":
    # Small, module-consistent shapes (per-batch row counts sublane-aligned).
    batch_size = 2
    num_stocks = 8
    num_news = 8
    in_channel = 16
    hidden_channel = 32
    out_channel = 16
    n_class = 4

    stocks_len = batch_size * num_stocks     # 16
    news_len = batch_size * num_news         # 16

    key = jax.random.PRNGKey(0)
    k_x, k_p = jax.random.split(key)

    x = jax.random.normal(k_x, (stocks_len, in_channel), jnp.float32)

    # edge_index: row 0 = news (source), row 1 = stock (destination); each stock
    # in a batch is connected to every news item of the same batch.
    src, dst = [], []
    for b in range(batch_size):
        for s in range(num_stocks):
            for n in range(num_news):
                src.append(b * num_news + n)
                dst.append(b * num_stocks + s)
    edge_index = jnp.array([src, dst], dtype=jnp.int32)

    params = make_params(k_p, in_channel, hidden_channel, out_channel, n_class)

    out = our_model_pallas(x, params, num_stocks=num_stocks,
                           num_news=num_news, n_class=n_class)
    out = jax.block_until_ready(out)

    ref = our_model_reference(x, edge_index, params, news_len, n_class)
    assert out.shape == (stocks_len, n_class)
    max_diff = float(jnp.max(jnp.abs(out - ref)))
    assert jnp.allclose(out, ref, atol=3e-2, rtol=3e-2), (
        f"mismatch vs reference: max abs diff {max_diff}")

    print("KERNEL_OK")
</pallas_src>

<mosaic_0001>
module attributes {stable_mosaic.version = 11 : i64} {
  func.func @_our_model_kernel(%arg0: i32, %arg1: memref<16x128xbf16, #tpu.memory_space<vmem>>, %arg2: memref<128x128xbf16, #tpu.memory_space<vmem>>, %arg3: memref<1x128xf32, #tpu.memory_space<vmem>>, %arg4: memref<128x128xbf16, #tpu.memory_space<vmem>>, %arg5: memref<1x128xf32, #tpu.memory_space<vmem>>, %arg6: memref<128x128xbf16, #tpu.memory_space<vmem>>, %arg7: memref<1x128xf32, #tpu.memory_space<vmem>>, %arg8: memref<128x128xbf16, #tpu.memory_space<vmem>>, %arg9: memref<1x128xf32, #tpu.memory_space<vmem>>, %arg10: memref<128x128xbf16, #tpu.memory_space<vmem>>, %arg11: memref<1x128xf32, #tpu.memory_space<vmem>>, %arg12: memref<128x128xbf16, #tpu.memory_space<vmem>>, %arg13: memref<1x128xf32, #tpu.memory_space<vmem>>, %arg14: memref<128x128xbf16, #tpu.memory_space<vmem>>, %arg15: memref<1x128xf32, #tpu.memory_space<vmem>>, %arg16: memref<2x128xf32, #tpu.memory_space<vmem>>) attributes {dimension_semantics = [#tpu.dimension_semantics<parallel>], iteration_bounds = array<i64: 1>, scalar_prefetch = 0 : i64, scratch_operands = 0 : i64, tpu.core_type = #tpu.core_type<tc>, window_params = [{transform_indices = @transform_0, window_bounds = array<i64: 16, 128>}, {pipeline_mode = #tpu.pipeline_mode<synchronous>, transform_indices = @transform_1, window_bounds = array<i64: 128, 128>}, {pipeline_mode = #tpu.pipeline_mode<synchronous>, transform_indices = @transform_2, window_bounds = array<i64: 1, 128>}, {pipeline_mode = #tpu.pipeline_mode<synchronous>, transform_indices = @transform_3, window_bounds = array<i64: 128, 128>}, {pipeline_mode = #tpu.pipeline_mode<synchronous>, transform_indices = @transform_4, window_bounds = array<i64: 1, 128>}, {pipeline_mode = #tpu.pipeline_mode<synchronous>, transform_indices = @transform_5, window_bounds = array<i64: 128, 128>}, {pipeline_mode = #tpu.pipeline_mode<synchronous>, transform_indices = @transform_6, window_bounds = array<i64: 1, 128>}, {pipeline_mode = #tpu.pipeline_mode<synchronous>, transform_indices = @transform_7, window_bounds = array<i64: 128, 128>}, {pipeline_mode = #tpu.pipeline_mode<synchronous>, transform_indices = @transform_8, window_bounds = array<i64: 1, 128>}, {pipeline_mode = #tpu.pipeline_mode<synchronous>, transform_indices = @transform_9, window_bounds = array<i64: 128, 128>}, {pipeline_mode = #tpu.pipeline_mode<synchronous>, transform_indices = @transform_10, window_bounds = array<i64: 1, 128>}, {pipeline_mode = #tpu.pipeline_mode<synchronous>, transform_indices = @transform_11, window_bounds = array<i64: 128, 128>}, {pipeline_mode = #tpu.pipeline_mode<synchronous>, transform_indices = @transform_12, window_bounds = array<i64: 1, 128>}, {pipeline_mode = #tpu.pipeline_mode<synchronous>, transform_indices = @transform_13, window_bounds = array<i64: 128, 128>}, {pipeline_mode = #tpu.pipeline_mode<synchronous>, transform_indices = @transform_14, window_bounds = array<i64: 1, 128>}, {transform_indices = @transform_15, window_bounds = array<i64: 2, 128>}]} {
    %c0 = arith.constant 0 : index
    %c0_0 = arith.constant 0 : index
    %0 = vector.load %arg1[%c0, %c0_0] : memref<16x128xbf16, #tpu.memory_space<vmem>>, vector<16x128xbf16>
    %c0_1 = arith.constant 0 : index
    %c0_2 = arith.constant 0 : index
    %1 = vector.load %arg2[%c0_1, %c0_2] : memref<128x128xbf16, #tpu.memory_space<vmem>>, vector<128x128xbf16>
    %cst = arith.constant dense<0.000000e+00> : vector<16x128xf32>
    %2 = tpu.matmul %0, %1, %cst {dimension_numbers = #tpu.dot_dimension_numbers<[1], [0], [0], [1], [0, 0, 1, 1], [], []>} : vector<16x128xbf16>, vector<128x128xbf16>, vector<16x128xf32> -> vector<16x128xf32>
    %c0_3 = arith.constant 0 : index
    %c0_4 = arith.constant 0 : index
    %3 = vector.load %arg3[%c0_3, %c0_4] : memref<1x128xf32, #tpu.memory_space<vmem>>, vector<1x128xf32>
    %4 = vector.broadcast %3 : vector<1x128xf32> to vector<16x128xf32>
    %5 = arith.addf %2, %4 : vector<16x128xf32>
    %cst_5 = arith.constant 0.000000e+00 : f32
    %6 = vector.broadcast %cst_5 : f32 to vector<16x128xf32>
    %7 = arith.maximumf %5, %6 : vector<16x128xf32>
    %8 = vector.shape_cast %7 : vector<16x128xf32> to vector<2x8x128xf32>
    %cst_6 = arith.constant dense<0.000000e+00> : vector<2x128xf32>
    %9 = vector.multi_reduction <add>, %8, %cst_6 [1] : vector<2x8x128xf32> to vector<2x128xf32>
    %10 = arith.truncf %9 : vector<2x128xf32> to vector<2x128xbf16>
    %c0_7 = arith.constant 0 : index
    %c0_8 = arith.constant 0 : index
    %11 = vector.load %arg4[%c0_7, %c0_8] : memref<128x128xbf16, #tpu.memory_space<vmem>>, vector<128x128xbf16>
    %cst_9 = arith.constant dense<0.000000e+00> : vector<2x128xf32>
    %12 = tpu.matmul %10, %11, %cst_9 {dimension_numbers = #tpu.dot_dimension_numbers<[1], [0], [0], [1], [0, 0, 1, 1], [], []>} : vector<2x128xbf16>, vector<128x128xbf16>, vector<2x128xf32> -> vector<2x128xf32>
    %c0_10 = arith.constant 0 : index
    %c0_11 = arith.constant 0 : index
    %13 = vector.load %arg5[%c0_10, %c0_11] : memref<1x128xf32, #tpu.memory_space<vmem>>, vector<1x128xf32>
    %14 = vector.broadcast %13 : vector<1x128xf32> to vector<2x128xf32>
    %15 = arith.addf %12, %14 : vector<2x128xf32>
    %cst_12 = arith.constant 0.000000e+00 : f32
    %16 = vector.broadcast %cst_12 : f32 to vector<2x128xf32>
    %17 = arith.maximumf %15, %16 : vector<2x128xf32>
    %cst_13 = arith.constant 8.000000e+00 : f32
    %18 = vector.broadcast %cst_13 : f32 to vector<2x128xf32>
    %19 = arith.mulf %18, %17 : vector<2x128xf32>
    %20 = arith.truncf %19 : vector<2x128xf32> to vector<2x128xbf16>
    %c0_14 = arith.constant 0 : index
    %c0_15 = arith.constant 0 : index
    %21 = vector.load %arg6[%c0_14, %c0_15] : memref<128x128xbf16, #tpu.memory_space<vmem>>, vector<128x128xbf16>
    %cst_16 = arith.constant dense<0.000000e+00> : vector<2x128xf32>
    %22 = tpu.matmul %20, %21, %cst_16 {dimension_numbers = #tpu.dot_dimension_numbers<[1], [0], [0], [1], [0, 0, 1, 1], [], []>} : vector<2x128xbf16>, vector<128x128xbf16>, vector<2x128xf32> -> vector<2x128xf32>
    %c0_17 = arith.constant 0 : index
    %c0_18 = arith.constant 0 : index
    %23 = vector.load %arg7[%c0_17, %c0_18] : memref<1x128xf32, #tpu.memory_space<vmem>>, vector<1x128xf32>
    %24 = vector.broadcast %23 : vector<1x128xf32> to vector<2x128xf32>
    %25 = arith.addf %22, %24 : vector<2x128xf32>
    %cst_19 = arith.constant 0.000000e+00 : f32
    %26 = vector.broadcast %cst_19 : f32 to vector<2x128xf32>
    %27 = arith.maximumf %25, %26 : vector<2x128xf32>
    %28 = arith.truncf %27 : vector<2x128xf32> to vector<2x128xbf16>
    %c0_20 = arith.constant 0 : index
    %c0_21 = arith.constant 0 : index
    %29 = vector.load %arg8[%c0_20, %c0_21] : memref<128x128xbf16, #tpu.memory_space<vmem>>, vector<128x128xbf16>
    %cst_22 = arith.constant dense<0.000000e+00> : vector<2x128xf32>
    %30 = tpu.matmul %28, %29, %cst_22 {dimension_numbers = #tpu.dot_dimension_numbers<[1], [0], [0], [1], [0, 0, 1, 1], [], []>} : vector<2x128xbf16>, vector<128x128xbf16>, vector<2x128xf32> -> vector<2x128xf32>
    %c0_23 = arith.constant 0 : index
    %c0_24 = arith.constant 0 : index
    %31 = vector.load %arg9[%c0_23, %c0_24] : memref<1x128xf32, #tpu.memory_space<vmem>>, vector<1x128xf32>
    %32 = vector.broadcast %31 : vector<1x128xf32> to vector<2x128xf32>
    %33 = arith.addf %30, %32 : vector<2x128xf32>
    %cst_25 = arith.constant 0.000000e+00 : f32
    %34 = vector.broadcast %cst_25 : f32 to vector<2x128xf32>
    %35 = arith.maximumf %33, %34 : vector<2x128xf32>
    %cst_26 = arith.constant 8.000000e+00 : f32
    %36 = vector.broadcast %cst_26 : f32 to vector<2x128xf32>
    %37 = arith.mulf %36, %35 : vector<2x128xf32>
    %38 = arith.truncf %37 : vector<2x128xf32> to vector<2x128xbf16>
    %c0_27 = arith.constant 0 : index
    %c0_28 = arith.constant 0 : index
    %39 = vector.load %arg10[%c0_27, %c0_28] : memref<128x128xbf16, #tpu.memory_space<vmem>>, vector<128x128xbf16>
    %cst_29 = arith.constant dense<0.000000e+00> : vector<2x128xf32>
    %40 = tpu.matmul %38, %39, %cst_29 {dimension_numbers = #tpu.dot_dimension_numbers<[1], [0], [0], [1], [0, 0, 1, 1], [], []>} : vector<2x128xbf16>, vector<128x128xbf16>, vector<2x128xf32> -> vector<2x128xf32>
    %c0_30 = arith.constant 0 : index
    %c0_31 = arith.constant 0 : index
    %41 = vector.load %arg11[%c0_30, %c0_31] : memref<1x128xf32, #tpu.memory_space<vmem>>, vector<1x128xf32>
    %42 = vector.broadcast %41 : vector<1x128xf32> to vector<2x128xf32>
    %43 = arith.addf %40, %42 : vector<2x128xf32>
    %cst_32 = arith.constant 0.000000e+00 : f32
    %44 = vector.broadcast %cst_32 : f32 to vector<2x128xf32>
    %45 = arith.maximumf %43, %44 : vector<2x128xf32>
    %cst_33 = arith.constant 8.000000e+00 : f32
    %46 = vector.broadcast %cst_33 : f32 to vector<2x128xf32>
    %47 = arith.mulf %46, %45 : vector<2x128xf32>
    %48 = arith.truncf %47 : vector<2x128xf32> to vector<2x128xbf16>
    %c0_34 = arith.constant 0 : index
    %c0_35 = arith.constant 0 : index
    %49 = vector.load %arg12[%c0_34, %c0_35] : memref<128x128xbf16, #tpu.memory_space<vmem>>, vector<128x128xbf16>
    %cst_36 = arith.constant dense<0.000000e+00> : vector<2x128xf32>
    %50 = tpu.matmul %48, %49, %cst_36 {dimension_numbers = #tpu.dot_dimension_numbers<[1], [0], [0], [1], [0, 0, 1, 1], [], []>} : vector<2x128xbf16>, vector<128x128xbf16>, vector<2x128xf32> -> vector<2x128xf32>
    %c0_37 = arith.constant 0 : index
    %c0_38 = arith.constant 0 : index
    %51 = vector.load %arg13[%c0_37, %c0_38] : memref<1x128xf32, #tpu.memory_space<vmem>>, vector<1x128xf32>
    %52 = vector.broadcast %51 : vector<1x128xf32> to vector<2x128xf32>
    %53 = arith.addf %50, %52 : vector<2x128xf32>
    %cst_39 = arith.constant 0.000000e+00 : f32
    %54 = vector.broadcast %cst_39 : f32 to vector<2x128xf32>
    %55 = arith.maximumf %53, %54 : vector<2x128xf32>
    %56 = arith.truncf %55 : vector<2x128xf32> to vector<2x128xbf16>
    %c0_40 = arith.constant 0 : index
    %c0_41 = arith.constant 0 : index
    %57 = vector.load %arg14[%c0_40, %c0_41] : memref<128x128xbf16, #tpu.memory_space<vmem>>, vector<128x128xbf16>
    %cst_42 = arith.constant dense<0.000000e+00> : vector<2x128xf32>
    %58 = tpu.matmul %56, %57, %cst_42 {dimension_numbers = #tpu.dot_dimension_numbers<[1], [0], [0], [1], [0, 0, 1, 1], [], []>} : vector<2x128xbf16>, vector<128x128xbf16>, vector<2x128xf32> -> vector<2x128xf32>
    %c0_43 = arith.constant 0 : index
    %c0_44 = arith.constant 0 : index
    %59 = vector.load %arg15[%c0_43, %c0_44] : memref<1x128xf32, #tpu.memory_space<vmem>>, vector<1x128xf32>
    %60 = vector.broadcast %59 : vector<1x128xf32> to vector<2x128xf32>
    %61 = arith.addf %58, %60 : vector<2x128xf32>
    %62 = arith.negf %61 : vector<2x128xf32>
    %63 = math.exp %62 : vector<2x128xf32>
    %cst_45 = arith.constant 1.000000e+00 : f32
    %64 = vector.broadcast %cst_45 : f32 to vector<2x128xf32>
    %65 = arith.addf %64, %63 : vector<2x128xf32>
    %66 = arith.divf %64, %65 : vector<2x128xf32>
    %c0_46 = arith.constant 0 : index
    %c0_47 = arith.constant 0 : index
    %67 = vector.load %arg16[%c0_46, %c0_47] : memref<2x128xf32, #tpu.memory_space<vmem>>, vector<2x128xf32>
    tpu.vector_store %arg16[%c0_46, %c0_47], %66 {strides = array<i32>} : memref<2x128xf32, #tpu.memory_space<vmem>>, vector<2x128xf32>,
    return
  }
  func.func @transform_0(%arg0: i32) -> (i32, i32) {
    %c0_i32 = arith.constant 0 : i32
    %c0_i32_0 = arith.constant 0 : i32
    return %arg0, %c0_i32 : i32, i32
  }
  func.func @transform_1(%arg0: i32) -> (i32, i32) {
    %c0_i32 = arith.constant 0 : i32
    %c0_i32_0 = arith.constant 0 : i32
    %c0_i32_1 = arith.constant 0 : i32
    return %c0_i32, %c0_i32_0 : i32, i32
  }
  func.func @transform_2(%arg0: i32) -> (i32, i32) {
    %c0_i32 = arith.constant 0 : i32
    %c0_i32_0 = arith.constant 0 : i32
    %c0_i32_1 = arith.constant 0 : i32
    return %c0_i32, %c0_i32_0 : i32, i32
  }
  func.func @transform_3(%arg0: i32) -> (i32, i32) {
    %c0_i32 = arith.constant 0 : i32
    %c0_i32_0 = arith.constant 0 : i32
    %c0_i32_1 = arith.constant 0 : i32
    return %c0_i32, %c0_i32_0 : i32, i32
  }
  func.func @transform_4(%arg0: i32) -> (i32, i32) {
    %c0_i32 = arith.constant 0 : i32
    %c0_i32_0 = arith.constant 0 : i32
    %c0_i32_1 = arith.constant 0 : i32
    return %c0_i32, %c0_i32_0 : i32, i32
  }
  func.func @transform_5(%arg0: i32) -> (i32, i32) {
    %c0_i32 = arith.constant 0 : i32
    %c0_i32_0 = arith.constant 0 : i32
    %c0_i32_1 = arith.constant 0 : i32
    return %c0_i32, %c0_i32_0 : i32, i32
  }
  func.func @transform_6(%arg0: i32) -> (i32, i32) {
    %c0_i32 = arith.constant 0 : i32
    %c0_i32_0 = arith.constant 0 : i32
    %c0_i32_1 = arith.constant 0 : i32
    return %c0_i32, %c0_i32_0 : i32, i32
  }
  func.func @transform_7(%arg0: i32) -> (i32, i32) {
    %c0_i32 = arith.constant 0 : i32
    %c0_i32_0 = arith.constant 0 : i32
    %c0_i32_1 = arith.constant 0 : i32
    return %c0_i32, %c0_i32_0 : i32, i32
  }
  func.func @transform_8(%arg0: i32) -> (i32, i32) {
    %c0_i32 = arith.constant 0 : i32
    %c0_i32_0 = arith.constant 0 : i32
    %c0_i32_1 = arith.constant 0 : i32
    return %c0_i32, %c0_i32_0 : i32, i32
  }
  func.func @transform_9(%arg0: i32) -> (i32, i32) {
    %c0_i32 = arith.constant 0 : i32
    %c0_i32_0 = arith.constant 0 : i32
    %c0_i32_1 = arith.constant 0 : i32
    return %c0_i32, %c0_i32_0 : i32, i32
  }
  func.func @transform_10(%arg0: i32) -> (i32, i32) {
    %c0_i32 = arith.constant 0 : i32
    %c0_i32_0 = arith.constant 0 : i32
    %c0_i32_1 = arith.constant 0 : i32
    return %c0_i32, %c0_i32_0 : i32, i32
  }
  func.func @transform_11(%arg0: i32) -> (i32, i32) {
    %c0_i32 = arith.constant 0 : i32
    %c0_i32_0 = arith.constant 0 : i32
    %c0_i32_1 = arith.constant 0 : i32
    return %c0_i32, %c0_i32_0 : i32, i32
  }
  func.func @transform_12(%arg0: i32) -> (i32, i32) {
    %c0_i32 = arith.constant 0 : i32
    %c0_i32_0 = arith.constant 0 : i32
    %c0_i32_1 = arith.constant 0 : i32
    return %c0_i32, %c0_i32_0 : i32, i32
  }
  func.func @transform_13(%arg0: i32) -> (i32, i32) {
    %c0_i32 = arith.constant 0 : i32
    %c0_i32_0 = arith.constant 0 : i32
    %c0_i32_1 = arith.constant 0 : i32
    return %c0_i32, %c0_i32_0 : i32, i32
  }
  func.func @transform_14(%arg0: i32) -> (i32, i32) {
    %c0_i32 = arith.constant 0 : i32
    %c0_i32_0 = arith.constant 0 : i32
    %c0_i32_1 = arith.constant 0 : i32
    return %c0_i32, %c0_i32_0 : i32, i32
  }
  func.func @transform_15(%arg0: i32) -> (i32, i32) {
    %c0_i32 = arith.constant 0 : i32
    %c0_i32_0 = arith.constant 0 : i32
    return %arg0, %c0_i32 : i32, i32
  }
}

</mosaic_0001>

<bundles_post_ra>
// kernel: our_model_pallas.1
= control target key start
LH: loop header
LB: loop body
LE: loop exit
PB: predicated region body
PF: predicated region fallthrough
CT: control target
= control target key end

     0   :  { %vm180_vm0 = vcmask 1041409   ;;  %s1259_s1 = inlined_call_operand.vmem [shape: bf16[128,128], index: 1, kind: input, shape index: {}]   ;;  %s1260_s2 = inlined_call_operand.vmem [shape: f32[1,128], index: 2, kind: input, shape index: {}]   ;;  %s1261_s0 = inlined_call_operand.vmem [shape: bf16[16,128], index: 0, kind: input, shape index: {}]   ;;  %s1262_s4 = inlined_call_operand.vmem [shape: f32[1,128], index: 4, kind: input, shape index: {}]   ;;  %s1263_s3 = inlined_call_operand.vmem [shape: bf16[128,128], index: 3, kind: input, shape index: {}]   ;;  %s1264_s5 = inlined_call_operand.vmem [shape: bf16[128,128], index: 5, kind: input, shape index: {}]   ;;  %s1265_s6 = inlined_call_operand.vmem [shape: f32[1,128], index: 6, kind: input, shape index: {}]   ;;  %s1266_s7 = inlined_call_operand.vmem [shape: bf16[128,128], index: 7, kind: input, shape index: {}]   ;;  %s1267_s8 = inlined_call_operand.vmem [shape: f32[1,128], index: 8, kind: input, shape index: {}]   ;;  %s1268_s9 = inlined_call_operand.vmem [shape: bf16[128,128], index: 9, kind: input, shape index: {}]   ;;  %s1269_s10 = inlined_call_operand.vmem [shape: f32[1,128], index: 10, kind: input, shape index: {}]   ;;  %s1270_s11 = inlined_call_operand.vmem [shape: bf16[128,128], index: 11, kind: input, shape index: {}]   ;;  %s1271_s12 = inlined_call_operand.vmem [shape: f32[1,128], index: 12, kind: input, shape index: {}]   ;;  %s1272_s13 = inlined_call_operand.vmem [shape: bf16[128,128], index: 13, kind: input, shape index: {}]   ;;  %s1273_s14 = inlined_call_operand.vmem [shape: f32[1,128], index: 14, kind: input, shape index: {}]   ;;  %s1274_s15 = inlined_call_operand.vmem [shape: f32[2,128], index: 15, kind: output, shape index: {}]  }
   0x1   :  { %v924_v0 = vld [vmem:[%s1259_s1 + $0x38] sm:$0xff]  ;;  %v923_v1 = vld [vmem:[%s1259_s1 + $0x30] sm:$0xff]  ;;  %v922_v2 = vld [vmem:[%s1259_s1 + $0x28] sm:$0xff] }
   0x2   :  { %126 = vmatpush.bf16.msra.mxu0 %v924_v0  ;;  %v921_v3 = vld [vmem:[%s1259_s1 + $0x20] sm:$0xff]  ;;  %v920_v4 = vld [vmem:[%s1259_s1 + $0x18] sm:$0xff]  ;;  %v919_v5 = vld [vmem:[%s1259_s1 + $0x10] sm:$0xff] }
   0x3   :  { %v918_v6 = vld [vmem:[%s1259_s1 + $0x8] sm:$0xff]  ;;  %v917_v7 = vld [vmem:[%s1259_s1] sm:$0xff]  ;;  %v932_v9 = vld [vmem:[%s1263_s3 + $0x38] sm:$0xff] }
   0x4   :  { %v916_v8 = vld [vmem:[%s1261_s0] sm:$0xff]  ;;  %232 = vmatpush.bf16.msra.mxu1 %v932_v9  ;;  %v931_v10 = vld [vmem:[%s1263_s3 + $0x30] sm:$0xff]  ;;  %v930_v11 = vld [vmem:[%s1263_s3 + $0x28] sm:$0xff] }
   0x5   :  { %v929_v12 = vld [vmem:[%s1263_s3 + $0x20] sm:$0xff]  ;;  %v928_v13 = vld [vmem:[%s1263_s3 + $0x18] sm:$0xff]  ;;  %v927_v14 = vld [vmem:[%s1263_s3 + $0x10] sm:$0xff] }
   0x6   :  { %127 = vmatpush.bf16.msra.mxu0 %v923_v1  ;;  %v926_v15 = vld [vmem:[%s1263_s3 + $0x8] sm:$0xff]  ;;  %v925_v16 = vld [vmem:[%s1263_s3] sm:$0xff]  ;;  %v940_v19 = vld [vmem:[%s1264_s5 + $0x38] sm:$0xff] }
   0x7   :  { %v973_v17 = vld [vmem:[%s1260_s2] ss:$0 sm:$0xff]  ;;  %316 = vmatpush.bf16.msra.mxu2 %v940_v19  ;;  %v939_v21 = vld [vmem:[%s1264_s5 + $0x30] sm:$0xff]  ;;  %v938_v24 = vld [vmem:[%s1264_s5 + $0x28] sm:$0xff] }
   0x8   :  { %233 = vmatpush.bf16.msra.mxu1 %v931_v10  ;;  %v937_v29 = vld [vmem:[%s1264_s5 + $0x20] sm:$0xff]  ;;  %v936_v33 = vld [vmem:[%s1264_s5 + $0x18] sm:$0xff]  ;;  %v935_v37 = vld [vmem:[%s1264_s5 + $0x10] sm:$0xff] }
   0x9   :  { %v934_v48 = vld [vmem:[%s1264_s5 + $0x8] sm:$0xff]  ;;  %v933_v49 = vld [vmem:[%s1264_s5] sm:$0xff]  ;;  %v948_v50 = vld [vmem:[%s1266_s7 + $0x38] sm:$0xff] }
   0xa   :  { %128 = vmatpush.bf16.msra.mxu0 %v922_v2  ;;  %399 = vmatpush.bf16.msra.mxu3 %v948_v50  ;;  %v947_v51 = vld [vmem:[%s1266_s7 + $0x30] sm:$0xff]  ;;  %v946_v52 = vld [vmem:[%s1266_s7 + $0x28] sm:$0xff]  ;;  %v945_v53 = vld [vmem:[%s1266_s7 + $0x20] sm:$0xff] }
   0xb   :  { %317 = vmatpush.bf16.msra.mxu2 %v939_v21  ;;  %v944_v54 = vld [vmem:[%s1266_s7 + $0x18] sm:$0xff]  ;;  %v943_v55 = vld [vmem:[%s1266_s7 + $0x10] sm:$0xff]  ;;  %v974_v56 = vld [vmem:[%s1262_s4] ss:$0 sm:$0xff] }
   0xc   :  { %234 = vmatpush.bf16.msra.mxu1 %v930_v11  ;;  %v942_v63 = vld [vmem:[%s1266_s7 + $0x8] sm:$0xff]  ;;  %v941_v0 = vld [vmem:[%s1266_s7] sm:$0xff]  ;;  %v956_v1 = vld [vmem:[%s1268_s9 + $0x38] sm:$0xff] }
   0xd   :  { %v955_v2 = vld [vmem:[%s1268_s9 + $0x30] sm:$0xff]  ;;  %v960_v19 = vld [vmem:[%s1270_s11 + $0x18] sm:$0xff]  ;;  %v976_v21 = vld [vmem:[%s1267_s8] ss:$0 sm:$0xff] }
   0xe   :  { %129 = vmatpush.bf16.msra.mxu0 %v921_v3  ;;  %400 = vmatpush.bf16.msra.mxu3 %v947_v51  ;;  %v954_v3 = vld [vmem:[%s1268_s9 + $0x28] sm:$0xff]  ;;  %v979_v51 = vld [vmem:[%s1273_s14] ss:$0 sm:$0xff] }
   0xf   :  { %318 = vmatpush.bf16.msra.mxu2 %v938_v24 }
  0x10   :  { %235 = vmatpush.bf16.msra.mxu1 %v929_v12 }
  0x12   :  { %130 = vmatpush.bf16.msra.mxu0 %v920_v4  ;;  %401 = vmatpush.bf16.msra.mxu3 %v946_v52  ;;  %v953_v4 = vld [vmem:[%s1268_s9 + $0x20] sm:$0xff] }
  0x13   :  { %319 = vmatpush.bf16.msra.mxu2 %v937_v29  ;;  %v957_v29 = vld [vmem:[%s1270_s11] sm:$0xff] }
  0x14   :  { %236 = vmatpush.bf16.msra.mxu1 %v928_v13  ;;  %v950_v13 = vld [vmem:[%s1268_s9 + $0x8] sm:$0xff] }
  0x16   :  { %131 = vmatpush.bf16.msra.mxu0 %v919_v5  ;;  %402 = vmatpush.bf16.msra.mxu3 %v945_v53  ;;  %v952_v5 = vld [vmem:[%s1268_s9 + $0x18] sm:$0xff] }
  0x17   :  { %320 = vmatpush.bf16.msra.mxu2 %v936_v33  ;;  %v969_v33 = vld [vmem:[%s1272_s13 + $0x20] sm:$0xff] }
  0x18   :  { %237 = vmatpush.bf16.msra.mxu1 %v927_v14  ;;  %v949_v14 = vld [vmem:[%s1268_s9] sm:$0xff] }
  0x1a   :  { %132 = vmatpush.bf16.msra.mxu0 %v918_v6  ;;  %403 = vmatpush.bf16.msra.mxu3 %v944_v54  ;;  %v951_v6 = vld [vmem:[%s1268_s9 + $0x10] sm:$0xff] }
  0x1b   :  { %321 = vmatpush.bf16.msra.mxu2 %v935_v37 }
  0x1c   :  { %238 = vmatpush.bf16.msra.mxu1 %v926_v15  ;;  %v964_v15 = vld [vmem:[%s1270_s11 + $0x38] sm:$0xff] }
  0x1e   :  { %133 = vmatpush.bf16.msra.mxu0 %v917_v7  ;;  %404 = vmatpush.bf16.msra.mxu3 %v943_v55  ;;  %v975_v7 = vld [vmem:[%s1265_s6] ss:$0 sm:$0xff] }
  0x1f   :  { %322 = vmatpush.bf16.msra.mxu2 %v934_v48 }
  0x20   :  { %239 = vmatpush.bf16.msra.mxu1 %v925_v16  ;;  %v963_v16 = vld [vmem:[%s1270_s11 + $0x30] sm:$0xff] }
  0x21   :  { %134 = vmatmul.bf16.vlgmr.msra.gmra.mxu0 %v916_v8 }
  0x22   :  { %405 = vmatpush.bf16.msra.mxu3 %v942_v63  ;;  %483 = vmatpush.bf16.msrb.mxu0 %v956_v1 }
  0x23   :  { %323 = vmatpush.bf16.msra.mxu2 %v933_v49 }
  0x24   :  { %567 = vmatpush.bf16.msrb.mxu1 %v964_v15 }
  0x26   :  { %406 = vmatpush.bf16.msra.mxu3 %v941_v0  ;;  %484 = vmatpush.bf16.msrb.mxu0 %v955_v2 }
  0x28   :  { %568 = vmatpush.bf16.msrb.mxu1 %v963_v16 }
  0x2a   :  { %485 = vmatpush.bf16.msrb.mxu0 %v954_v3 }
  0x2e   :  { %486 = vmatpush.bf16.msrb.mxu0 %v953_v4 }
  0x32   :  { %487 = vmatpush.bf16.msrb.mxu0 %v952_v5 }
  0x36   :  { %488 = vmatpush.bf16.msrb.mxu0 %v951_v6 }
  0x3a   :  { %489 = vmatpush.bf16.msrb.mxu0 %v950_v13 }
  0x3e   :  { %490 = vmatpush.bf16.msrb.mxu0 %v949_v14 }
  0x9e   :  { %v135_v18 = vpop.f32.mrf.mxu0 }
  0x9f   :  { %v136_v20 = vadd.f32 %v973_v17, %v135_v18  ;;  %v961_v18 = vld [vmem:[%s1270_s11 + $0x20] sm:$0xff] }
  0xa1   :  { %v140_v22 = vmax.f32 %v136_v20, 0.0  ;;  %v959_v20 = vld [vmem:[%s1270_s11 + $0x10] sm:$0xff] }
  0xa3   :  { %v142_v23 = vrot.slane %v140_v22, 4 }
  0xa5   :  { %v143_v25 = vadd.f32 %v142_v23, %v140_v22 }
  0xa6   :  { %v137_v26 = vpop.f32.mrf.mxu0 }
  0xa7   :  { %v144_v27 = vrot.slane %v143_v25, 2  ;;  %v138_v28 = vadd.f32 %v973_v17, %v137_v26  ;;  %v962_v17 = vld [vmem:[%s1270_s11 + $0x28] sm:$0xff] }
  0xa8   :  { %569 = vmatpush.bf16.msrb.mxu1 %v962_v17 }
  0xa9   :  { %v145_v30 = vadd.f32 %v144_v27, %v143_v25  ;;  %v141_v31 = vmax.f32 %v138_v28, 0.0  ;;  %v958_v28 = vld [vmem:[%s1270_s11 + $0x8] sm:$0xff] }
  0xab   :  { %v148_v32 = vrot.slane %v141_v31, 4  ;;  %v146_v34 = vrot.slane %v145_v30, 1 }
  0xac   :  { %570 = vmatpush.bf16.msrb.mxu1 %v961_v18 }
  0xad   :  { %v149_v35 = vadd.f32 %v148_v32, %v141_v31  ;;  %v147_v38 = vadd.f32 %v146_v34, %v145_v30  ;;  %v972_v30 = vld [vmem:[%s1272_s13 + $0x38] sm:$0xff]  ;;  %v971_v31 = vld [vmem:[%s1272_s13 + $0x30] sm:$0xff]  ;;  %v970_v32 = vld [vmem:[%s1272_s13 + $0x28] sm:$0xff] }
  0xae   :  { %650 = vmatpush.bf16.msrb.mxu2 %v972_v30  ;;  %v968_v34 = vld [vmem:[%s1272_s13 + $0x18] sm:$0xff] }
  0xaf   :  { %v150_v36 = vrot.slane %v149_v35, 2  ;;  %v154_v42 = vpack.c.bf16 %v147_v38, %v147_v38 }
  0xb0   :  { %571 = vmatpush.bf16.msrb.mxu1 %v960_v19 }
  0xb1   :  { %v151_v39 = vadd.f32 %v150_v36, %v149_v35  ;;  %v178_v44 = vunpack.c.l.b16 %v154_v42  ;;  %v967_v35 = vld [vmem:[%s1272_s13 + $0x10] sm:$0xff]  ;;  %v977_v36 = vld [vmem:[%s1269_s10] ss:$0 sm:$0xff] }
  0xb2   :  { %651 = vmatpush.bf16.msrb.mxu2 %v971_v31 }
  0xb3   :  { %v152_v40 = vrot.slane %v151_v39, 1 }
  0xb4   :  { %572 = vmatpush.bf16.msrb.mxu1 %v959_v20 }
  0xb5   :  { %v153_v41 = vadd.f32 %v152_v40, %v151_v39 }
  0xb6   :  { %652 = vmatpush.bf16.msrb.mxu2 %v970_v32 }
  0xb7   :  { %v155_v43 = vpack.c.bf16 %v153_v41, %v153_v41 }
  0xb8   :  { %573 = vmatpush.bf16.msrb.mxu1 %v958_v28 }
  0xb9   :  { %v179_v45 = vunpack.c.l.b16 %v155_v43  ;;  %v966_v43 = vld [vmem:[%s1272_s13 + $0x8] sm:$0xff] }
  0xba   :  { %653 = vmatpush.bf16.msrb.mxu2 %v969_v33 }
  0xbb   :  { %v181_v46 = vsel %vm180_vm0, %v179_v45, %v178_v44  ;;  %v965_v44 = vld [vmem:[%s1272_s13] sm:$0xff] }
  0xbc   :  { %v182_v47 = vpack.c.b16 %v181_v46, %v181_v46  ;;  %574 = vmatpush.bf16.msrb.mxu1 %v957_v29  ;;  %v978_v45 = vld [vmem:[%s1271_s12] ss:$0 sm:$0xff] }
  0xbe   :  { %240 = vmatmul.bf16.vlgmr.msra.gmra.mxu1 %v182_v47  ;;  %654 = vmatpush.bf16.msrb.mxu2 %v968_v34 }
  0xc2   :  { %655 = vmatpush.bf16.msrb.mxu2 %v967_v35 }
  0xc6   :  { %656 = vmatpush.bf16.msrb.mxu2 %v966_v43 }
  0xca   :  { %657 = vmatpush.bf16.msrb.mxu2 %v965_v44 }
 0x13b   :  { %v241_v57 = vpop.f32.mrf.mxu1 }
 0x13c   :  { %v242_v58 = vadd.f32 %v974_v56, %v241_v57 }
 0x13e   :  { %v245_v59 = vmax.f32 %v242_v58, 0.0 }
 0x140   :  { %v246_v60 = vmul.f32 8.0, %v245_v59 }
 0x142   :  { %v247_v61 = vpack.c.bf16 %v246_v60, %v246_v60 }
 0x143   :  { %v243_v62 = vpop.f32.mrf.mxu1 }
 0x144   :  { %324 = vmatmul.bf16.vlgmr.msra.gmra.mxu2 %v247_v61 }
 0x1c7   :  { %v325_v8 = vpop.f32.mrf.mxu2 }
 0x1c8   :  { %v326_v9 = vadd.f32 %v975_v7, %v325_v8 }
 0x1ca   :  { %v329_v10 = vmax.f32 %v326_v9, 0.0 }
 0x1cc   :  { %v330_v11 = vpack.c.bf16 %v329_v10, %v329_v10 }
 0x1ce   :  { %407 = vmatmul.bf16.vlgmr.msra.gmra.mxu3 %v330_v11 }
 0x1cf   :  { %v327_v12 = vpop.f32.mrf.mxu2 }
 0x251   :  { %v408_v22 = vpop.f32.mrf.mxu3 }
 0x252   :  { %v409_v23 = vadd.f32 %v976_v21, %v408_v22 }
 0x254   :  { %v412_v24 = vmax.f32 %v409_v23, 0.0 }
 0x256   :  { %v413_v25 = vmul.f32 8.0, %v412_v24 }
 0x258   :  { %v414_v26 = vpack.c.bf16 %v413_v25, %v413_v25 }
 0x259   :  { %v410_v27 = vpop.f32.mrf.mxu3 }
 0x25a   :  { %491 = vmatmul.bf16.vlgmr.msrb.gmra.mxu0 %v414_v26 }
 0x2d7   :  { %v492_v37 = vpop.f32.mrf.mxu0 }
 0x2d8   :  { %v493_v38 = vadd.f32 %v977_v36, %v492_v37 }
 0x2da   :  { %v496_v39 = vmax.f32 %v493_v38, 0.0 }
 0x2dc   :  { %v497_v40 = vmul.f32 8.0, %v496_v39 }
 0x2de   :  { %v498_v41 = vpack.c.bf16 %v497_v40, %v497_v40 }
 0x2df   :  { %v494_v42 = vpop.f32.mrf.mxu0 }
 0x2e0   :  { %575 = vmatmul.bf16.vlgmr.msrb.gmra.mxu1 %v498_v41 }
 0x35d   :  { %v576_v46 = vpop.f32.mrf.mxu1 }
 0x35e   :  { %v577_v47 = vadd.f32 %v978_v45, %v576_v46 }
 0x360   :  { %v580_v48 = vmax.f32 %v577_v47, 0.0 }
 0x362   :  { %v581_v49 = vpack.c.bf16 %v580_v48, %v580_v48 }
 0x364   :  { %658 = vmatmul.bf16.vlgmr.msrb.gmra.mxu2 %v581_v49 }
 0x365   :  { %v578_v50 = vpop.f32.mrf.mxu1 }
 0x3e7   :  { %v659_v52 = vpop.f32.mrf.mxu2 }
 0x3e8   :  { %v660_v53 = vadd.f32 %v979_v51, %v659_v52 }
 0x3ea   :  { %v915_v54 = vmul.f32 -1.442695, %v660_v53 }
 0x3ec   :  { %980 = vpow2.f32 %v915_v54 }
 0x3ef   :  { %v661_v55 = vpop.f32.mrf.mxu2 }
 0x3f2   :  { %v981_v56 = vpop.eup %980 }
 0x3f3   :  { %v666_v57 = vadd.f32 1.0, %v981_v56 }
 0x3f5   :  { %982 = vrcp.f32 %v666_v57  ;;  %v678_v61 = vand.u32 2147483648, %v666_v57  ;;  %v676_v63 = vand.u32 2147483647, %v666_v57  ;;  %vm672_vm2 = vweird.f32 %v666_v57 }
 0x3f7   :  { %v679_v1 = vor.u32 1.1754944e-38, %v678_v61  ;;  %vm677_vm4 = vcmp.eq.f32.partialorder %v676_v63, 8.507059e+37 }
 0x3fb   :  { %v983_v58 = vpop.eup %982 }
 0x3fc   :  { %v668_v59 = vmul.f32 %v983_v58, %v666_v57  ;;  %vm673_vm1 = vweird.f32 %v983_v58 }
 0x3fd   :  { %vm674_vm3 = vmor %vm672_vm2, %vm673_vm1 }
 0x3fe   :  { %v669_v60 = vsub.f32 1.0, %v668_v59 }
 0x400   :  { %v670_v62 = vmul.f32 %v983_v58, %v669_v60 }
 0x402   :  { %v671_v0 = vadd.f32 %v983_v58, %v670_v62 }
 0x404   :  { %v675_v2 = vsel %vm674_vm3, %v983_v58, %v671_v0 }
 0x405   :  { %v680_v3 = vsel %vm677_vm4, %v679_v1, %v675_v2 }
 0x406   :  { %682 = vst [vmem:[%s1274_s15] sm:$0x3] %v680_v3 }

</bundles_post_ra>
